<compile_context>
chip_gen: v7x
topology: tpu7x:2x2x1
jax: 0.10.0
libtpu: 0.0.40
codegen_flags: <defaults>
</compile_context>

<pallas_src>
import jax
import jax.numpy as jnp
from jax.experimental import pallas as pl
from jax.experimental.pallas import tpu as pltpu

LN_EPS = 1e-5  # PyTorch nn.LayerNorm default eps


def _pos_enc_ln_kernel(x_ref, pe_ref, o_ref):
    # x_ref / pe_ref / o_ref: (TILE_ROWS, D) -- batch dim squeezed away.
    y = x_ref[...].astype(jnp.float32) + pe_ref[...].astype(jnp.float32)
    mean = jnp.mean(y, axis=-1, keepdims=True)
    centered = y - mean
    var = jnp.mean(centered * centered, axis=-1, keepdims=True)
    o_ref[...] = (centered * jax.lax.rsqrt(var + LN_EPS)).astype(o_ref.dtype)


def _cdiv(a, b):
    return -(-a // b)


def _round_up(a, m):
    return _cdiv(a, m) * m


def _pick_vmem_limit_bytes():
    """min(physical_VMEM / 2, 64 MiB): 32 MiB on v7x, 64 MiB on v5e/v6e."""
    fallback_capacity = 64 * 1024 * 1024  # v7x per-TC VMEM (most constrained)
    capacity = fallback_capacity
    try:
        info = pltpu.get_tpu_info()
        cap_attr = int(getattr(info, "vmem_capacity_bytes", 0) or 0)
        if cap_attr > 0:
            capacity = cap_attr
    except Exception:
        pass
    return min(capacity // 2, 64 * 1024 * 1024)


def _choose_tile_rows(T, D, itemsize, vmem_limit_bytes):
    """Pick (tile_rows, num_row_tiles).

    Budget = 75% of vmem_limit, charged for the 3 double-buffered I/O streams
    (x-in, pe-in, out) PLUS ~3 full-tile f32 temporaries (y, centered,
    centered^2) from the two-pass LayerNorm.  tile_rows is aligned to the
    packed-sublane granule of the dtype.  T is split into >= 2 row tiles
    (for v7x's two TensorCores) whenever that is possible, with cdiv + masked
    tail covering any remainder.
    """
    row_align = 32 if itemsize == 1 else (16 if itemsize == 2 else 8)
    per_row_bytes = D * (itemsize * 6 + 4 * 3)  # 3 streams x 2 bufs + 3 f32 temps
    budget = int(vmem_limit_bytes * 0.75)
    cap = (budget // per_row_bytes) // row_align * row_align
    cap = max(row_align, min(cap, 2048))

    if T < 2 * row_align:
        # Too small to split into two aligned blocks: one full-extent block
        # (block dim == full array dim is always legal).
        return T, 1

    if T <= cap:
        # Split into exactly 2 row tiles so both v7x TensorCores get work.
        tile_r = _round_up(_cdiv(T, 2), row_align)
        return tile_r, _cdiv(T, tile_r)  # == 2

    tile_r = cap
    num_t = _cdiv(T, tile_r)
    if num_t % 2 == 1:
        # Try to even out the outer-axis block count (balanced 2-TC sharding).
        tile2 = _round_up(_cdiv(T, num_t + 1), row_align)
        if 0 < tile2 <= cap and _cdiv(T, tile2) == num_t + 1:
            tile_r, num_t = tile2, num_t + 1
    return tile_r, num_t


def learned_positional_encoding(x, emb_table):
    """x: (B, T, D); emb_table: (max_len, D).  Returns LayerNorm(x + pe[:T])."""
    B, T, D = x.shape
    max_len, D_e = emb_table.shape
    assert D_e == D, "embedding dim mismatch"
    assert T <= max_len, "sequence length exceeds max_len of the embedding table"

    vmem_limit = _pick_vmem_limit_bytes()
    tile_r, num_t = _choose_tile_rows(T, D, x.dtype.itemsize, vmem_limit)

    itemsize = x.dtype.itemsize
    cost = pl.CostEstimate(
        flops=6 * B * T * D,                  # add, sub, square, scale + 2 reduces
        transcendentals=B * T,                # one rsqrt per row
        bytes_accessed=2 * B * T * D * itemsize + T * D * emb_table.dtype.itemsize,
    )

    # If T is too small to give the outer row-tile axis >= 2 blocks, shard the
    # batch axis across TensorCores instead (PE block index is constant there,
    # so the re-DMA-skip is preserved either way).
    batch_outer = (num_t == 1 and B >= 2)
    if batch_outer:
        grid = (B, num_t)
        x_spec = pl.BlockSpec((None, tile_r, D), lambda b, t: (b, t, 0))
        pe_spec = pl.BlockSpec((tile_r, D), lambda b, t: (t, 0))
        o_spec = pl.BlockSpec((None, tile_r, D), lambda b, t: (b, t, 0))
    else:
        grid = (num_t, B)
        x_spec = pl.BlockSpec((None, tile_r, D), lambda t, b: (b, t, 0))
        pe_spec = pl.BlockSpec((tile_r, D), lambda t, b: (t, 0))
        o_spec = pl.BlockSpec((None, tile_r, D), lambda t, b: (b, t, 0))

    return pl.pallas_call(
        _pos_enc_ln_kernel,
        out_shape=jax.ShapeDtypeStruct((B, T, D), x.dtype),
        grid_spec=pltpu.PrefetchScalarGridSpec(
            num_scalar_prefetch=0,
            grid=grid,
            in_specs=[x_spec, pe_spec],
            out_specs=o_spec,
        ),
        compiler_params=pltpu.CompilerParams(
            # Outer axis sharded across TensorCores; inner axis sequential so
            # consecutive steps reuse the VMEM-resident PE tile.
            dimension_semantics=("parallel", "arbitrary"),
            vmem_limit_bytes=vmem_limit,
        ),
        cost_estimate=cost,
    )(x, emb_table)


if __name__ == "__main__":
    key = jax.random.PRNGKey(0)
    k_x, k_emb, k_x2 = jax.random.split(key, 3)

    def _reference(x, emb):
        T = x.shape[1]
        y = x + emb[:T][None, :, :]
        mean = jnp.mean(y, axis=-1, keepdims=True)
        var = jnp.mean((y - mean) ** 2, axis=-1, keepdims=True)
        return (y - mean) / jnp.sqrt(var + LN_EPS)

    # Case 1: tiny seq (num_t == 1) -> batch-outer grid path.
    emb_dim, max_len, batch, seq = 32, 16, 2, 8
    emb_table = jax.random.normal(k_emb, (max_len, emb_dim), dtype=jnp.float32)
    x = jax.random.normal(k_x, (batch, seq, emb_dim), dtype=jnp.float32)
    out = jax.block_until_ready(learned_positional_encoding(x, emb_table))
    assert out.shape == (batch, seq, emb_dim)
    assert jnp.max(jnp.abs(out - _reference(x, emb_table))) < 1e-5

    # Case 2: seq split into 2 row tiles with a masked cdiv tail
    # (T=20 -> tile_r=16, num_t=2, last block padded/masked).
    batch2, seq2, max_len2 = 2, 20, 24
    emb_table2 = jax.random.normal(k_emb, (max_len2, emb_dim), dtype=jnp.float32)
    x2 = jax.random.normal(k_x2, (batch2, seq2, emb_dim), dtype=jnp.float32)
    out2 = jax.block_until_ready(learned_positional_encoding(x2, emb_table2))
    assert out2.shape == (batch2, seq2, emb_dim)
    assert jnp.max(jnp.abs(out2 - _reference(x2, emb_table2))) < 1e-5

    print("KERNEL_OK")
</pallas_src>

<mosaic_0001>
module attributes {stable_mosaic.version = 11 : i64} {
  func.func @_pos_enc_ln_kernel(%arg0: i32, %arg1: i32, %arg2: memref<1x8x32xf32, #tpu.memory_space<vmem>>, %arg3: memref<8x32xf32, #tpu.memory_space<vmem>>, %arg4: memref<1x8x32xf32, #tpu.memory_space<vmem>>) attributes {dimension_semantics = [#tpu.dimension_semantics<parallel>, #tpu.dimension_semantics<arbitrary>], iteration_bounds = array<i64: 2, 1>, scalar_prefetch = 0 : i64, scratch_operands = 0 : i64, tpu.core_type = #tpu.core_type<tc>, window_params = [{transform_indices = @transform_0, window_bounds = array<i64: 1, 8, 32>}, {transform_indices = @transform_1, window_bounds = array<i64: 8, 32>}, {transform_indices = @transform_2, window_bounds = array<i64: 1, 8, 32>}]} {
    %c0 = arith.constant 0 : index
    %c0_0 = arith.constant 0 : index
    %c0_1 = arith.constant 0 : index
    %0 = vector.load %arg2[%c0, %c0_0, %c0_1] : memref<1x8x32xf32, #tpu.memory_space<vmem>>, vector<1x8x32xf32>
    %1 = vector.shape_cast %0 : vector<1x8x32xf32> to vector<8x32xf32>
    %c0_2 = arith.constant 0 : index
    %c0_3 = arith.constant 0 : index
    %2 = vector.load %arg3[%c0_2, %c0_3] : memref<8x32xf32, #tpu.memory_space<vmem>>, vector<8x32xf32>
    %3 = arith.addf %1, %2 : vector<8x32xf32>
    %cst = arith.constant dense<0.000000e+00> : vector<8xf32>
    %4 = vector.multi_reduction <add>, %3, %cst [1] : vector<8x32xf32> to vector<8xf32>
    %5 = vector.shape_cast %4 : vector<8xf32> to vector<8x1xf32>
    %cst_4 = arith.constant 3.200000e+01 : f32
    %6 = vector.broadcast %cst_4 : f32 to vector<8x1xf32>
    %7 = arith.divf %5, %6 : vector<8x1xf32>
    %8 = vector.broadcast %7 : vector<8x1xf32> to vector<8x32xf32>
    %9 = arith.subf %3, %8 : vector<8x32xf32>
    %10 = arith.mulf %9, %9 : vector<8x32xf32>
    %cst_5 = arith.constant dense<0.000000e+00> : vector<8xf32>
    %11 = vector.multi_reduction <add>, %10, %cst_5 [1] : vector<8x32xf32> to vector<8xf32>
    %12 = vector.shape_cast %11 : vector<8xf32> to vector<8x1xf32>
    %cst_6 = arith.constant 3.200000e+01 : f32
    %13 = vector.broadcast %cst_6 : f32 to vector<8x1xf32>
    %14 = arith.divf %12, %13 : vector<8x1xf32>
    %cst_7 = arith.constant 9.99999974E-6 : f32
    %15 = vector.broadcast %cst_7 : f32 to vector<8x1xf32>
    %16 = arith.addf %14, %15 : vector<8x1xf32>
    %17 = math.rsqrt %16 : vector<8x1xf32>
    %18 = vector.broadcast %17 : vector<8x1xf32> to vector<8x32xf32>
    %19 = arith.mulf %9, %18 : vector<8x32xf32>
    %c0_8 = arith.constant 0 : index
    %c0_9 = arith.constant 0 : index
    %c0_10 = arith.constant 0 : index
    %20 = vector.load %arg4[%c0_8, %c0_9, %c0_10] : memref<1x8x32xf32, #tpu.memory_space<vmem>>, vector<1x8x32xf32>
    %21 = vector.shape_cast %20 : vector<1x8x32xf32> to vector<8x32xf32>
    %22 = vector.shape_cast %19 : vector<8x32xf32> to vector<1x8x32xf32>
    tpu.vector_store %arg4[%c0_8, %c0_9, %c0_10], %22 {strides = array<i32>} : memref<1x8x32xf32, #tpu.memory_space<vmem>>, vector<1x8x32xf32>,
    return
  }
  func.func @transform_0(%arg0: i32, %arg1: i32) -> (i32, i32, i32) {
    %c0_i32 = arith.constant 0 : i32
    %c0_i32_0 = arith.constant 0 : i32
    return %arg0, %arg1, %c0_i32 : i32, i32, i32
  }
  func.func @transform_1(%arg0: i32, %arg1: i32) -> (i32, i32) {
    %c0_i32 = arith.constant 0 : i32
    %c0_i32_0 = arith.constant 0 : i32
    return %arg1, %c0_i32 : i32, i32
  }
  func.func @transform_2(%arg0: i32, %arg1: i32) -> (i32, i32, i32) {
    %c0_i32 = arith.constant 0 : i32
    %c0_i32_0 = arith.constant 0 : i32
    return %arg0, %arg1, %c0_i32 : i32, i32, i32
  }
}

</mosaic_0001>

<bundles_post_ra>
// kernel: tpu_custom_call.1
= control target key start
LH: loop header
LB: loop body
LE: loop exit
PB: predicated region body
PF: predicated region fallthrough
CT: control target
= control target key end

     0   :  { %7 = vsyncpa [#allocation3], 0  ;;  %s798_s0 = inlined_call_operand.hbm [shape: f32[2,8,32], index: 0, kind: input, shape index: {}]   ;;  %s799_s1 = inlined_call_operand.hbm [shape: f32[16,32], index: 1, kind: input, shape index: {}]   ;;  %s800_s2 = inlined_call_operand.hbm [shape: f32[2,8,32], index: 2, kind: output, shape index: {}]  }
   0x1   :  { %9 = vsyncpa [#allocation3 + $0x1], 0 }
   0x2   :  { %10 = vsyncpa [#allocation6], 0 }
   0x3   :  { %11 = vsyncpa [#allocation4], 0 }
   0x4   :  { %13 = vsyncpa [#allocation4 + $0x1], 0  ;;  %s576_s9 = smov 0   ;;  %s578_s10 = smov 0  }
   0x5   :  { %s580_s11 = smov 0   ;;  %s582_s12 = smov 0  }
   0x6   :  { %s584_s13 = smov 0   ;;  %s586_s14 = smov 0  }
   0x7 LB: > { %s322_s15 = sadd.s32 4294967295, %s556_s14   ;;  %s323_s16 = sadd.s32 4294967294, %s556_s14   ;;  %s556_s14 = sphi %s586_s14, %s19_s14   ;;  %s552_s13 = sphi %s584_s13, %s825_s13   ;;  %s548_s12 = sphi %s582_s12, %s824_s12   ;;  %s544_s11 = sphi %s580_s11, %s823_s11   ;;  %s540_s10 = sphi %s578_s10, %s822_s10   ;;  %s536_s9 = sphi %s576_s9, %s821_s9  }
   0x8   : > { %p53_p0 = scmp.ne.s32.totalorder %s540_s10, %s536_s9  ;;  %p610_p1 = scmp.eq.s32.totalorder %s322_s15, 0 }
   0x9   : > { %p614_p2 = scmp.eq.s32.totalorder %s322_s15, 1  ;;  %p111_p3 = scmp.eq.s32.totalorder %s323_s16, 1 }
   0xa   : > { %s805_s17 = scalar_select %p610_p1, 1, 0 }
   0xb   : > { %s806_s18 = scalar_select %p614_p2, 1, 0 }
   0xc   : > { %p620_p4 = por %p610_p1, %p53_p0  ;;  %p324_p5 = scmp.ge.s32.totalorder %s556_s14, 1 }
   0xd   : > { %p625_p6 = por %p111_p3, %p53_p0  ;;  %p118_p7 = scmp.lt.s32.totalorder %s556_s14, 3 }
   0xe   : > { %s807_s19 = scalar_select %p620_p4, 1, 0 }
   0xf   : > { %s808_s20 = scalar_select %p625_p6, 1, 0 }
  0x10   : > { %p630_p8 = pnand %p324_p5, %p118_p7  ;;  %s558_s22 = smov [#allocation5]  }
  0x11   : > { %s133_s23 = sshll.u32 %s558_s22, 4  ;;  %s31_s25 = sadd.s32 1, %s552_s13  ;;  %s134_s23 = int_to_ptr.vmem [resolvable:$true] %s133_s23 }
  0x12   : > { %s809_s21 = scalar_select %p630_p8, 1, 0 }
  0x13   : > { %p345_p10 = pneg %p630_p8  ;;  %s40_s26 = sadd.s32 1, %s544_s11 }
  0x14   : > { %p645_p12 = scmp.ge.s32.totalorder %s31_s25, 2  ;;  %s412_s30 = scalar_lea.hbm %s799_s1, 128 }
  0x15   : > { %p639_p11 = pnand %p345_p10, %p610_p1  ;;  %p413_p13 = scmp.ne.s32.totalorder %s799_s1, %s412_s30 }
  0x16   : > { %s811_s27 = scalar_select %p645_p12, 1, 0 }
  0x17   : > { %p414_p0 = pneg %p639_p11  ;;  %s417_s7 = scalar_lea.hbm %s799_s1, 256 }
  0x18   : > { %p418_p7 = scmp.lt.u32.totalorder %s417_s7, %s412_s30  ;;  %p419_p10 = scmp.lt.u32.totalorder %s412_s30, %s799_s1 }
  0x19   : > { %p415_p3 = pnand %p414_p0, %p413_p13 }
  0x1a   : > { %p420_p9 = por %p419_p10, %p418_p7 }
  0x1b   : > { %p416_p5 = pneg %p415_p3 }
  0x1d   : > { %p421_p6 = pnand %p420_p9, %p416_p5 }
  0x1f   : > { %424 = shalt.err (!%p421_p6)
}
  0x20   : > { %s425_s16 = scalar_lea.vmem %s134_s23, 128  ;;  %p433_p2 = scmp.lt.s32.totalorder %s134_s23, %s134_s23 }
  0x21   : > { %p426_p1 = scmp.ne.s32.totalorder %s134_s23, %s425_s16  ;;  %p434_p12 = scmp.lt.s32.totalorder %s425_s16, %s425_s16 }
  0x23   : > { %p428_p4 = pnand %p426_p1, %p414_p0  ;;  %p435_p13 = por %p434_p12, %p433_p2 }
  0x25   : > { %p429_p8 = pneg %p428_p4 }
  0x27   : > { %p436_p3 = pnand %p435_p13, %p429_p8 }
  0x29   : > { %439 = shalt.err (!%p436_p3)
}
  0x2a   : > { %348 = dma.hbm_to_vmem [thread:$0]  (!%p639_p11), %s799_s1, 128, %s134_s23, [#allocation6]  }
  0x2b   : > { %p812_p1 = scmp.ne.s32.totalorder %s811_s27, 0  ;;  %p47_p2 = scmp.ne.s32.totalorder %s544_s11, %s540_s10 }
  0x2c   : > { %p48_p4 = scmp.eq.s32.totalorder %s556_s14, 0  ;;  %p358_p6 = scmp.lt.s32.totalorder %s556_s14, 2 }
  0x2d   : > { %s827_s25 = smov (%p812_p1, %s31_s25), 0  ;;  %p813_p12 = scmp.ne.s32.totalorder %s806_s18, 0 }
  0x2e   : > { %s35_s24 = ssub.s32 %s552_s13, %s827_s25  ;;  %p49_p9 = por %p48_p4, %p47_p2 }
  0x2f   : > { %p38_p8 = scmp.eq.s32.totalorder %s35_s24, 0  ;;  %p680_p0 = por %p813_p12, %p47_p2 }
  0x30   : > { %s144_s30 = sand.u32 1, %s544_s11   ;;  %s328_s27 = sshll.u32 %s552_s13, 7 }
  0x31   : > { %s688_s3 = scalar_select %p38_p8, %s544_s11, %s40_s26  }
  0x32   : > { %s327_s23 = sshll.u32 %s144_s30, 3  ;;  %s694_s6 = scalar_lea.hbm %s798_s0, %s328_s27 }
  0x33   : > { %s148_s18 = scalar_lea.vmem [#allocation2], %s327_s23  ;;  %p698_p11 = pnand %p358_p6, %p49_p9 }
  0x34   : > { %s156_s7 = sshll.u32 %s148_s18, 4  ;;  %s145_s26 = scalar_lea.sflag [#allocation3], %s144_s30  ;;  %s696_s7 = int_to_ptr.vmem [resolvable:$true] %s156_s7 }
  0x35   : > { %s440_s15 = scalar_lea.hbm %s694_s6, 128  ;;  %p442_p7 = pneg %p698_p11 }
  0x36   : > { %p441_p5 = scmp.ne.s32.totalorder %s694_s6, %s440_s15  ;;  %s445_s28 = scalar_lea.hbm %s798_s0, 256 }
  0x37   : > { %p446_p3 = scmp.lt.u32.totalorder %s694_s6, %s798_s0  ;;  %p447_p1 = scmp.lt.u32.totalorder %s445_s28, %s440_s15 }
  0x38   : > { %p443_p10 = pnand %p442_p7, %p441_p5  ;;  %p449_p4 = scmp.lt.u32.totalorder %s440_s15, %s694_s6 }
  0x39   : > { %p448_p2 = por %p447_p1, %p446_p3 }
  0x3a   : > { %p444_p13 = pneg %p443_p10 }
  0x3b   : > { %p450_p6 = por %p449_p4, %p448_p2 }
  0x3d   : > { %p451_p8 = pnand %p450_p6, %p444_p13 }
  0x3f   : > { %454 = shalt.err (!%p451_p8)
}
  0x40   : > { %s455_s30 = scalar_lea.vmem %s696_s7, 128  ;;  %s559_s27 = smov [#allocation2]  }
  0x41   : > { %p456_p9 = scmp.ne.s32.totalorder %s696_s7, %s455_s30  ;;  %s460_s4 = sshll.u32 %s559_s27, 4  ;;  %s461_s4 = int_to_ptr.vmem [resolvable:$false] %s460_s4 }
  0x42   : > { %s462_s5 = scalar_lea.vmem %s461_s4, 256  ;;  %p463_p10 = scmp.lt.s32.totalorder %s696_s7, %s461_s4 }
  0x43   : > { %p458_p12 = pnand %p456_p9, %p442_p7  ;;  %p464_p3 = scmp.lt.s32.totalorder %s462_s5, %s455_s30 }
  0x45   : > { %p459_p5 = pneg %p458_p12  ;;  %p465_p1 = por %p464_p3, %p463_p10 }
  0x47   : > { %p466_p2 = pnand %p465_p1, %p459_p5 }
  0x49   : > { %469 = shalt.err (!%p466_p2)
}
  0x4a   : > { %352 = dma.hbm_to_vmem [thread:$0]  (!%p698_p11), %s694_s6, 128, %s696_s7, %s145_s26  }
  0x4b   : > { %p816_p13 = scmp.ne.s32.totalorder %s809_s21, 0 }
  0x4c   : > { %s730_s18 = sand.u32 (!%p816_p13), 1, %s540_s10   ;;  %p817_p7 = scmp.ne.s32.totalorder (!%p816_p13), %s807_s19, 0 }
  0x4d   : > { %165 = sbr.rel (%p816_p13) target bundleno = 414 (0x19e), region = 28  ;;  %s330_s15 = sshll.u32 (!%p816_p13), %s730_s18, 3 }
  0x4e   : > { %s168_s16 = scalar_lea.sflag (!%p816_p13), [#allocation3], %s730_s18  ;;  %s171_s22 = scalar_lea.vmem (!%p816_p13), [#allocation2], %s330_s15 }
  0x54   : > { %523 = dma.done.wait (%p817_p7), %s168_s16, 128  }
  0x55   : > { %525 = vsyncadd (%p817_p7), %s168_s16, 4294967168  ;;  %p818_p4 = scmp.ne.s32.totalorder %s805_s17, 0 }
  0x57   : > { %527 = dma.done.wait (%p818_p4), [#allocation6], 128  }
  0x58   : > { %529 = vsyncadd (%p818_p4), [#allocation6], 4294967168  ;;  %v196_v0 = vld [vmem:[%s171_s22] sm:$0xff]  ;;  %v197_v1 = vld [vmem:[#allocation5] sm:$0xff]  ;;  %vm199_vm0 = vcmask 261120   ;;  %s334_s17 = sshll.u32 %s548_s12, 7 }
  0x59   : > { %v198_v2 = vadd.f32 %v197_v1, %v196_v0  ;;  %s195_s19 = scalar_lea.vmem [#allocation7], %s330_s15  ;;  %s748_s8 = scalar_lea.hbm %s800_s2, %s334_s17 }
  0x5a   : > { %s230_s21 = sshll.u32 %s195_s19, 4  ;;  %s216_s26 = scalar_lea.sflag [#allocation4], %s730_s18  ;;  %s750_s21 = int_to_ptr.vmem [resolvable:$true] %s230_s21 }
  0x5b   : > { %v200_v3 = vsel %vm199_vm0, %v198_v2, 0.0  ;;  %s470_s28 = scalar_lea.vmem %s750_s21, 128  ;;  %s560_s12 = smov [#allocation7]  }
  0x5c   : > { %201 = vadd.xlane.f32.xlu0 %v200_v3  ;;  %p471_p11 = scmp.ne.s32.totalorder %s750_s21, %s470_s28  ;;  %s474_s24 = sshll.u32 %s560_s12, 4  ;;  %s475_s24 = int_to_ptr.vmem [resolvable:$false] %s474_s24 }
  0x5d   : > { %s476_s23 = scalar_lea.vmem %s475_s24, 256  ;;  %p477_p9 = scmp.lt.s32.totalorder %s750_s21, %s475_s24 }
  0x5e   : > { %p472_p6 = pnand %p471_p11, %p680_p0  ;;  %p478_p12 = scmp.lt.s32.totalorder %s476_s23, %s470_s28 }
  0x60   : > { %p473_p8 = pneg %p472_p6  ;;  %p479_p5 = por %p478_p12, %p477_p9 }
  0x62   : > { %p480_p10 = pnand %p479_p5, %p473_p8 }
  0xe9   : > { %v202_v4 = vpop.xlane.xlu0 %201 }
  0xea   : > { %v204_v5 = vmul.f32 0.03125, %v202_v4 }
  0xec   : > { %v205_v6 = vsub.f32 %v198_v2, %v204_v5 }
  0xee   : > { %v206_v7 = vmul.f32 %v205_v6, %v205_v6 }
  0xf0   : > { %v207_v8 = vsel %vm199_vm0, %v206_v7, 0.0 }
  0xf1   : > { %208 = vadd.xlane.f32.xlu0 %v207_v8 }
 0x17e   : > { %v209_v9 = vpop.xlane.xlu0 %208 }
 0x17f   : > { %v210_v10 = vmul.f32 0.03125, %v209_v9 }
 0x181   : > { %v211_v11 = vadd.f32 1e-05, %v210_v10 }
 0x183   : > { %410 = vrsqrt.f32 %v211_v11 }
 0x18d   : > { %v411_v12 = vpop.eup %410 }
 0x18e   : > { %v213_v13 = vmul.f32 %v411_v12, %v205_v6 }
 0x190   : > { %214 = vst.msk [vmem:[%s195_s19] sm:$0xff] %vm199_vm0, %v213_v13 }
 0x191   : > { %483 = shalt.err (!%p480_p10)
}
 0x192   : > { %s484_s30 = scalar_lea.hbm %s748_s8, 128  ;;  %s488_s5 = scalar_lea.hbm %s800_s2, 256 }
 0x193   : > { %p485_p3 = scmp.ne.s32.totalorder %s748_s8, %s484_s30  ;;  %p489_p13 = scmp.lt.u32.totalorder %s748_s8, %s800_s2 }
 0x194   : > { %p490_p7 = scmp.lt.u32.totalorder %s488_s5, %s484_s30  ;;  %p492_p11 = scmp.lt.u32.totalorder %s484_s30, %s748_s8 }
 0x195   : > { %p486_p1 = pnand %p485_p3, %p680_p0 }
 0x196   : > { %p491_p4 = por %p490_p7, %p489_p13 }
 0x197   : > { %p487_p2 = pneg %p486_p1 }
 0x198   : > { %p493_p6 = por %p492_p11, %p491_p4 }
 0x19a   : > { %p494_p8 = pnand %p493_p6, %p487_p2 }
 0x19c   : > { %497 = shalt.err (!%p494_p8)
}
 0x19d   : > { %343 = dma.vmem_to_hbm [thread:$0]  (%p680_p0), %s750_s21, 128, %s748_s8, %s216_s26  }
 0x19e PF: > { %s242_s16 = sand.u32 1, %s536_s9   ;;  %p819_p9 = scmp.ne.s32.totalorder %s808_s20, 0 }
 0x19f   : > { %p820_p12 = scmp.ge.s32.totalorder %s556_s14, 2  ;;  %s243_s22 = scalar_lea.sflag [#allocation4], %s242_s16 }
 0x1a1   : > { %p354_p5 = pnand %p820_p12, %p819_p9 }
 0x1a3   : > { %531 = dma.done.wait (!%p354_p5), %s243_s22, 128  }
 0x1a4   : > { %533 = vsyncadd (!%p354_p5), %s243_s22, 4294967168  ;;  %s19_s14 = sadd.s32 1, %s556_s14   ;;  %s821_s9 = smov %s540_s10 }
 0x1a5   : > { %p16_p10 = scmp.ge.s32.totalorder %s19_s14, 4   ;;  %s822_s10 = smov %s544_s11 }
 0x1a6   : > { %s823_s11 = smov %s688_s3  ;;  %s824_s12 = smov %s552_s13 }
 0x1a7   : > { %s825_s13 = smov %s827_s25  ;;  %18 = sbr.rel (!%p16_p10) target bundleno = 7 (0x7), region = 78 }
 0x1ae   :  { %248 = vsyncpa [#allocation3], 1 }
 0x1af   :  { %250 = vsyncpa [#allocation3 + $0x1], 1 }
 0x1b0   :  { %251 = vsyncpa [#allocation6], 1 }
 0x1b1   :  { %252 = vsyncpa [#allocation4], 1 }
 0x1b2   :  { %254 = vsyncpa [#allocation4 + $0x1], 1 }

</bundles_post_ra>
